<compile_context>
chip_gen: v6e
topology: v6e:2x2x1
jax: 0.10.0
libtpu: 0.0.40
codegen_flags: <defaults>
</compile_context>

<pallas_src>
import jax
import jax.numpy as jnp
from jax.experimental import pallas as pl
from jax.experimental.pallas import tpu as pltpu


def _relu_kernel(x_ref, o_ref):
    # Elementwise ReLU on the current VMEM tile (one VPU max per vreg).
    o_ref[...] = jnp.maximum(x_ref[...], jnp.zeros((), dtype=x_ref.dtype))


def _choose_lanes(n: int) -> int:
    """Widest lane count (multiple of 128) that exactly divides n, else 0."""
    for w in (1024, 512, 256, 128):
        if n % w == 0:
            return w
    return 0


def _default_block_bytes() -> int:
    """Generation-aware DMA block size (per buffer)."""
    try:
        kind = jax.devices()[0].device_kind.lower()
    except Exception:
        return 2 << 20
    # v5e: scoped-VMEM default is only 16 MiB and HBM BW is ~0.8 TB/s, so
    # 2-3 MiB blocks already keep per-step overhead < ~8%.
    if "v5 lite" in kind or "v5e" in kind or "v5lite" in kind:
        return 3 << 20
    # Older generations: stay conservative.
    if "v2" in kind or "v3" in kind or "v4" in kind:
        return 2 << 20
    # v6e / v7x (and newer): big blocks to amortize the ~0.35 us per-step
    # overhead against 1.3-3.2 TB/s HBM bandwidth.
    return 8 << 20


def lrp_relu_forward(
    x: jax.Array,
    *,
    block_bytes: int | None = None,
    min_kernel_bytes: int = 1 << 20,
    donate_input: bool = False,   # only saves an output allocation, not HBM traffic
) -> jax.Array:
    """Equivalent of LRP_ReLU().forward(x) for an arbitrary-shape tensor.

    NOTE: for a memory-bound elementwise op like this, a fused
    jnp.maximum(x, 0) inside the surrounding jit avoids the dedicated HBM
    round trip entirely and is strictly better when fusion is possible.
    """
    orig_shape = x.shape
    dtype = x.dtype
    n = x.size
    itemsize = jnp.dtype(dtype).itemsize

    # --- fallback paths: plain XLA elementwise (no pad/slice copies) ---------
    if n * itemsize < min_kernel_bytes:
        return jnp.maximum(x, jnp.zeros((), dtype=dtype))

    # Dtype-dependent sublane granularity (f32:8, bf16/f16:16, int8/fp8:32).
    sub = {4: 8, 2: 16, 1: 32}.get(itemsize)
    lanes = _choose_lanes(n)
    if sub is None or lanes == 0:
        # Element count not a multiple of 128 (or exotic dtype): the pad+slice
        # copies a kernel would need cost more than the kernel saves.
        return jnp.maximum(x, jnp.zeros((), dtype=dtype))

    # --- lane-dense, copy-free slab view ------------------------------------
    rows = n // lanes                              # exact: n % lanes == 0
    slab = x.reshape(rows, lanes)                  # metadata-only

    if block_bytes is None:
        block_bytes = _default_block_bytes()

    # Target rows per block (~block_bytes), kept a multiple of the sublane
    # granularity so every non-final block is fully aligned.
    target_rows = max(sub, (block_bytes // (lanes * itemsize)) // sub * sub)

    if rows <= target_rows:
        if rows >= 2 * sub:
            # Whole array fits one block: split so the "parallel" grid has two
            # steps and both v7x TensorCores issue DMAs (no-op on v5e/v6e).
            tile_rows = pl.cdiv(pl.cdiv(rows, 2), sub) * sub
        else:
            tile_rows = rows        # single full-extent block (always legal)
    else:
        tile_rows = target_rows

    grid = (pl.cdiv(rows, tile_rows),)   # ragged last block handled by Pallas

    tile_bytes = tile_rows * lanes * itemsize
    # 2 arrays (in + out) x double-buffering, plus a little headroom; clamp to
    # stay within physical VMEM on every generation (v7x: 64 MiB per TC).
    vmem_limit = min(max(4 * tile_bytes + (4 << 20), 16 << 20), 64 << 20)

    out = pl.pallas_call(
        _relu_kernel,
        out_shape=jax.ShapeDtypeStruct((rows, lanes), dtype),
        grid_spec=pltpu.PrefetchScalarGridSpec(
            num_scalar_prefetch=0,
            grid=grid,
            in_specs=[pl.BlockSpec((tile_rows, lanes), lambda i: (i, 0))],
            out_specs=pl.BlockSpec((tile_rows, lanes), lambda i: (i, 0)),
        ),
        compiler_params=pltpu.CompilerParams(
            dimension_semantics=("parallel",),
            vmem_limit_bytes=vmem_limit,
        ),
        input_output_aliases=({0: 0} if donate_input else {}),
    )(slab)

    return out.reshape(orig_shape)       # metadata-only


def lrp_relu_relprop(R: jax.Array) -> jax.Array:
    # relprop(R) = R  (identity; no kernel needed)
    return R


if __name__ == "__main__":
    key = jax.random.PRNGKey(0)

    # Small NCHW feature map consistent with the module; min_kernel_bytes=0
    # forces the Pallas path so the kernel itself is exercised at this size.
    x = jax.random.normal(key, (2, 4, 16, 16), dtype=jnp.float32)
    y = jax.block_until_ready(lrp_relu_forward(x, min_kernel_bytes=0))
    assert y.shape == x.shape and y.dtype == x.dtype
    assert bool(jnp.array_equal(y, jnp.maximum(x, 0.0))), "mismatch (f32 kernel)"

    # bf16 input exercises the 16-sublane granularity path through the kernel.
    xb = jax.random.normal(jax.random.PRNGKey(2), (2, 4, 16, 16)).astype(jnp.bfloat16)
    yb = jax.block_until_ready(lrp_relu_forward(xb, min_kernel_bytes=0))
    assert yb.dtype == jnp.bfloat16
    assert bool(jnp.array_equal(yb, jnp.maximum(xb, jnp.bfloat16(0)))), "mismatch (bf16)"

    # Ragged last block (rows % tile_rows != 0) through the kernel, no padding copy.
    xr = jax.random.normal(jax.random.PRNGKey(3), (2, 4, 40, 128), dtype=jnp.float32)
    yr = jax.block_until_ready(
        lrp_relu_forward(xr, min_kernel_bytes=0, block_bytes=64 << 10))
    assert bool(jnp.array_equal(yr, jnp.maximum(xr, 0.0))), "mismatch (ragged block)"

    # Element count not a multiple of 128 -> XLA fallback (no pad+slice copies).
    xo = jax.random.normal(jax.random.PRNGKey(4), (3, 5, 7, 11), dtype=jnp.float32)
    yo = jax.block_until_ready(lrp_relu_forward(xo))
    assert bool(jnp.array_equal(yo, jnp.maximum(xo, 0.0))), "mismatch (fallback)"

    # relprop is identity.
    R = jax.random.normal(jax.random.PRNGKey(1), x.shape, dtype=jnp.float32)
    assert bool(jnp.array_equal(lrp_relu_relprop(R), R))

    print("KERNEL_OK")
</pallas_src>

<mosaic_0001>
module attributes {stable_mosaic.version = 11 : i64} {
  func.func @_relu_kernel(%arg0: i32, %arg1: memref<2x1024xf32, #tpu.memory_space<vmem>>, %arg2: memref<2x1024xf32, #tpu.memory_space<vmem>>) attributes {dimension_semantics = [#tpu.dimension_semantics<parallel>], iteration_bounds = array<i64: 1>, scalar_prefetch = 0 : i64, scratch_operands = 0 : i64, tpu.core_type = #tpu.core_type<tc>, window_params = [{transform_indices = @transform_0, window_bounds = array<i64: 2, 1024>}, {transform_indices = @transform_1, window_bounds = array<i64: 2, 1024>}]} {
    %c0 = arith.constant 0 : index
    %c0_0 = arith.constant 0 : index
    %0 = vector.load %arg1[%c0, %c0_0] : memref<2x1024xf32, #tpu.memory_space<vmem>>, vector<2x1024xf32>
    %cst = arith.constant 0.000000e+00 : f32
    %1 = vector.broadcast %cst : f32 to vector<2x1024xf32>
    %2 = arith.maximumf %0, %1 : vector<2x1024xf32>
    %c0_1 = arith.constant 0 : index
    %c0_2 = arith.constant 0 : index
    %3 = vector.load %arg2[%c0_1, %c0_2] : memref<2x1024xf32, #tpu.memory_space<vmem>>, vector<2x1024xf32>
    tpu.vector_store %arg2[%c0_1, %c0_2], %2 {strides = array<i32>} : memref<2x1024xf32, #tpu.memory_space<vmem>>, vector<2x1024xf32>,
    return
  }
  func.func @transform_0(%arg0: i32) -> (i32, i32) {
    %c0_i32 = arith.constant 0 : i32
    %c0_i32_0 = arith.constant 0 : i32
    return %arg0, %c0_i32 : i32, i32
  }
  func.func @transform_1(%arg0: i32) -> (i32, i32) {
    %c0_i32 = arith.constant 0 : i32
    %c0_i32_0 = arith.constant 0 : i32
    return %arg0, %c0_i32 : i32, i32
  }
}

</mosaic_0001>

<bundles_post_ra>
// kernel: tpu_custom_call.1
= control target key start
LH: loop header
LB: loop body
LE: loop exit
PB: predicated region body
PF: predicated region fallthrough
CT: control target
= control target key end

     0   :  { %6 = vsyncpa [#allocation3], 0  ;;  %s106_s0 = inlined_call_operand.hbm [shape: f32[2,1024], index: 0, kind: input, shape index: {}]   ;;  %s107_s1 = inlined_call_operand.hbm [shape: f32[2,1024], index: 1, kind: output, shape index: {}]  }
   0x1   :  { %7 = vsyncpa [#allocation4], 0  ;;  %s88_s6 = smov [#allocation2]  }
   0x2   :  { %s14_s7 = sshll.u32 %s88_s6, 4  ;;  %s15_s7 = int_to_ptr.vmem [resolvable:$true] %s14_s7 }
   0x3   :  { %s52_s8 = scalar_lea.vmem %s15_s7, 256  ;;  %p57_p1 = scmp.lt.s32.totalorder %s15_s7, %s15_s7 }
   0x4   :  { %p53_p0 = scmp.ne.s32.totalorder %s15_s7, %s52_s8  ;;  %p58_p2 = scmp.lt.s32.totalorder %s52_s8, %s52_s8 }
   0x6   :  { %p59_p3 = por %p58_p2, %p57_p1 }
   0x8   :  { %p60_p4 = pnand %p59_p3, %p53_p0 }
   0xa   :  { %63 = shalt.err (!%p60_p4)
}
   0xb   :  { %17 = dma.hbm_to_vmem [thread:$0]  %s106_s0, 256, %s15_s7, [#allocation3]  }
   0xc   :  { %84 = dma.done.wait [#allocation3], 256  }
   0xd   :  { %85 = vsyncadd [#allocation3], 4294967040  ;;  %s89_s11 = smov [#allocation5]   ;;  %v21_v0 = vld [vmem:[#allocation2] sm:$0xff]  ;;  %v22_v1 = vld [vmem:[#allocation2 + $0x8] sm:$0xff] }
   0xe   :  { %s33_s12 = sshll.u32 %s89_s11, 4  ;;  %v23_v2 = vmax.f32 %v21_v0, 0.0  ;;  %v24_v3 = vmax.f32 %v22_v1, 0.0  ;;  %s34_s12 = int_to_ptr.vmem [resolvable:$true] %s33_s12 }
   0xf   :  { %s64_s13 = scalar_lea.vmem %s34_s12, 256  ;;  %p69_p6 = scmp.lt.s32.totalorder %s34_s12, %s34_s12 }
  0x10   :  { %25 = vst [vmem:[#allocation5] sm:$0xff] %v23_v2  ;;  %26 = vst [vmem:[#allocation5 + $0x8] sm:$0xff] %v24_v3  ;;  %p65_p5 = scmp.ne.s32.totalorder %s34_s12, %s64_s13  ;;  %p70_p7 = scmp.lt.s32.totalorder %s64_s13, %s64_s13 }
  0x12   :  { %p71_p8 = por %p70_p7, %p69_p6 }
  0x14   :  { %p72_p9 = pnand %p71_p8, %p65_p5 }
  0x16   :  { %75 = shalt.err (!%p72_p9)
}
  0x17   :  { %36 = dma.vmem_to_hbm [thread:$0]  %s34_s12, 256, %s107_s1, [#allocation4]  }
  0x18   :  { %86 = dma.done.wait [#allocation4], 256  }
  0x19   :  { %87 = vsyncadd [#allocation4], 4294967040 }
  0x1a   :  { %40 = vsyncpa [#allocation3], 1 }
  0x1b   :  { %41 = vsyncpa [#allocation4], 1 }

</bundles_post_ra>
